<compile_context>
chip_gen: v5e
topology: v5e:2x2
jax: 0.10.0
libtpu: 0.0.40
codegen_flags: <defaults>
</compile_context>

<pallas_src>
import math
import jax
import jax.numpy as jnp
from jax.experimental import pallas as pl
from jax.experimental.pallas import tpu as pltpu

# ---- problem sizes (small, consistent with the module) ----
B = 2          # batch
N1 = 16        # image-feature sequence length
N2 = 8         # latent sequence length
S = N1 + N2    # keys/values per batch
DIM = 32       # model dim D
DIM_HEAD = 16  # per-head dim
HEADS = 4
INNER = DIM_HEAD * HEADS  # 64
EPS = 1e-5


def _layernorm(x, w, b):
    # torch.nn.LayerNorm semantics: biased variance, eps inside sqrt.
    mu = jnp.mean(x, axis=-1, keepdims=True)
    var = jnp.mean((x - mu) ** 2, axis=-1, keepdims=True)
    return (x - mu) * jax.lax.rsqrt(var + EPS) * w + b


def perceiver_attention_kernel(kv_ref, lnw_ref, lnb_ref,
                               wq_ref, wkv_ref, wout_ref, o_ref):
    # ---- fused LayerNorm over all B*(N1+N2) rows with per-row affine ----
    kv_raw = kv_ref[...]                                    # (B*S, D) = (48, 32)
    mu = jnp.mean(kv_raw, axis=-1, keepdims=True)
    var = jnp.mean((kv_raw - mu) ** 2, axis=-1, keepdims=True)
    kvn = (kv_raw - mu) * jax.lax.rsqrt(var + EPS) * lnw_ref[...] + lnb_ref[...]

    # Normalized latents per batch = rows [N1:S) of each batch block
    # (aligned sublane-tile slices; reuses the fused LN result for norm2).
    q_in = jnp.concatenate(
        [kvn[b * S + N1:(b + 1) * S] for b in range(B)], axis=0)  # (B*N2, D)

    # ---- projections: one Q matmul, one fused 128-lane K/V matmul ----
    scale = DIM_HEAD ** -0.5   # applied once to q  (== (q*s)@(k*s)^T with s=dh^-0.25)
    q2d = jnp.dot(q_in, wq_ref[...],
                  preferred_element_type=jnp.float32) * scale      # (B*N2, INNER)
    kv2d = jnp.dot(kvn, wkv_ref[...],
                   preferred_element_type=jnp.float32)             # (B*S, 2*INNER)

    q3 = q2d.reshape(B, N2, INNER)         # (2, 8, 64)
    kv3 = kv2d.reshape(B, S, 2 * INNER)    # (2, 24, 128)
    wout = wout_ref[...]                   # (INNER, D) = (64, 32)

    # ---- multi-head attention; per-head output projections accumulated ----
    fin = jnp.zeros((B * N2, DIM), jnp.float32)
    for h in range(HEADS):                 # static, small
        lo = h * DIM_HEAD
        hi = lo + DIM_HEAD
        qh = q3[:, :, lo:hi]                         # (B, N2, dh)
        kh = kv3[:, :, lo:hi]                        # (B, S,  dh)
        vh = kv3[:, :, INNER + lo:INNER + hi]        # (B, S,  dh)

        att = jnp.einsum('bqd,bkd->bqk', qh, kh,
                         preferred_element_type=jnp.float32)       # (B, N2, S)
        att = att - jnp.max(att, axis=-1, keepdims=True)
        p = jnp.exp(att)
        p = p * pl.reciprocal(jnp.sum(p, axis=-1, keepdims=True))
        oh = jnp.einsum('bqk,bkd->bqd', p, vh,
                        preferred_element_type=jnp.float32)        # (B, N2, dh)

        fin = fin + jnp.dot(oh.reshape(B * N2, DIM_HEAD), wout[lo:hi, :],
                            preferred_element_type=jnp.float32)    # (B*N2, D)

    o_ref[...] = fin.astype(o_ref.dtype)


def perceiver_attention(x, latents, params):
    ln1w, ln1b, ln2w, ln2b, wq, wkv, wout = params

    # nn.Linear stores weight as (out_features, in_features); y = x @ W.T.
    wq_t = wq.T          # (D, INNER)
    wkv_t = wkv.T        # (D, 2*INNER)  -- fused K/V projection (128 lanes)
    wout_t = wout.T      # (INNER, D)

    # concat(x, latents) per batch, flattened to rows:
    # [x_b0 (N1), lat_b0 (N2), x_b1 (N1), lat_b1 (N2), ...]
    kv_raw = jnp.concatenate([x, latents], axis=1).reshape(B * S, DIM)

    # Per-row LayerNorm affine params: x rows -> norm1, latent rows -> norm2.
    lnw_rows = jnp.tile(
        jnp.concatenate([jnp.broadcast_to(ln1w, (N1, DIM)),
                         jnp.broadcast_to(ln2w, (N2, DIM))], axis=0), (B, 1))
    lnb_rows = jnp.tile(
        jnp.concatenate([jnp.broadcast_to(ln1b, (N1, DIM)),
                         jnp.broadcast_to(ln2b, (N2, DIM))], axis=0), (B, 1))

    out2d = pl.pallas_call(
        perceiver_attention_kernel,
        out_shape=jax.ShapeDtypeStruct((B * N2, DIM), x.dtype),
        grid=(1,),   # single step: whole (tiny) problem handled in one launch
        in_specs=[
            pl.BlockSpec((B * S, DIM), lambda i: (0, 0)),        # kv_raw
            pl.BlockSpec((B * S, DIM), lambda i: (0, 0)),        # per-row LN w
            pl.BlockSpec((B * S, DIM), lambda i: (0, 0)),        # per-row LN b
            pl.BlockSpec((DIM, INNER), lambda i: (0, 0)),        # Wq^T
            pl.BlockSpec((DIM, 2 * INNER), lambda i: (0, 0)),    # Wkv^T (fused)
            pl.BlockSpec((INNER, DIM), lambda i: (0, 0)),        # Wout^T
        ],
        out_specs=pl.BlockSpec((B * N2, DIM), lambda i: (0, 0)),
        compiler_params=pltpu.CompilerParams(
            dimension_semantics=("arbitrary",)),
    )(kv_raw, lnw_rows, lnb_rows, wq_t, wkv_t, wout_t)

    return out2d.reshape(B, N2, DIM)


def perceiver_attention_ref(x, latents, params):
    """Pure-JAX reference mirroring the PyTorch forward exactly."""
    ln1w, ln1b, ln2w, ln2b, wq, wkv, wout = params
    xn = _layernorm(x, ln1w, ln1b)
    ln = _layernorm(latents, ln2w, ln2b)
    b, l, _ = latents.shape
    q = ln @ wq.T
    kv_in = jnp.concatenate([xn, ln], axis=-2)
    kv = kv_in @ wkv.T
    k, v = kv[..., :INNER], kv[..., INNER:]

    def reshape_tensor(t):
        bs, length, width = t.shape
        return t.reshape(bs, length, HEADS, -1).transpose(0, 2, 1, 3)

    q, k, v = reshape_tensor(q), reshape_tensor(k), reshape_tensor(v)
    scale = 1.0 / math.sqrt(math.sqrt(DIM_HEAD))
    w = jnp.einsum("bhqd,bhkd->bhqk", q * scale, k * scale)
    w = jax.nn.softmax(w.astype(jnp.float32), axis=-1).astype(w.dtype)
    out = jnp.einsum("bhqk,bhkd->bhqd", w, v)
    out = out.transpose(0, 2, 1, 3).reshape(b, l, -1)
    return out @ wout.T


if __name__ == "__main__":
    key = jax.random.PRNGKey(0)
    keys = jax.random.split(key, 9)

    x = jax.random.normal(keys[0], (B, N1, DIM), dtype=jnp.float32)
    latents = jax.random.normal(keys[1], (B, N2, DIM), dtype=jnp.float32)

    # Deterministic synthetic parameters (shapes from the module __init__).
    ln1w = 1.0 + 0.1 * jax.random.normal(keys[2], (DIM,), dtype=jnp.float32)
    ln1b = 0.1 * jax.random.normal(keys[3], (DIM,), dtype=jnp.float32)
    ln2w = 1.0 + 0.1 * jax.random.normal(keys[4], (DIM,), dtype=jnp.float32)
    ln2b = 0.1 * jax.random.normal(keys[5], (DIM,), dtype=jnp.float32)
    wq = jax.random.normal(keys[6], (INNER, DIM), dtype=jnp.float32) / math.sqrt(DIM)
    wkv = jax.random.normal(keys[7], (2 * INNER, DIM), dtype=jnp.float32) / math.sqrt(DIM)
    wout = jax.random.normal(keys[8], (DIM, INNER), dtype=jnp.float32) / math.sqrt(INNER)

    params = (ln1w, ln1b, ln2w, ln2b, wq, wkv, wout)

    out = perceiver_attention(x, latents, params)
    out = jax.block_until_ready(out)

    ref = perceiver_attention_ref(x, latents, params)
    assert out.shape == (B, N2, DIM)
    assert jnp.allclose(out, ref, atol=1e-4, rtol=1e-4), \
        f"max abs err {jnp.max(jnp.abs(out - ref))}"

    print("KERNEL_OK")
</pallas_src>

<mosaic_0001>
module attributes {stable_mosaic.version = 11 : i64} {
  func.func @perceiver_attention_kernel(%arg0: i32, %arg1: memref<48x32xf32, #tpu.memory_space<vmem>>, %arg2: memref<48x32xf32, #tpu.memory_space<vmem>>, %arg3: memref<48x32xf32, #tpu.memory_space<vmem>>, %arg4: memref<32x64xf32, #tpu.memory_space<vmem>>, %arg5: memref<32x128xf32, #tpu.memory_space<vmem>>, %arg6: memref<64x32xf32, #tpu.memory_space<vmem>>, %arg7: memref<16x32xf32, #tpu.memory_space<vmem>>) attributes {dimension_semantics = [#tpu.dimension_semantics<arbitrary>], iteration_bounds = array<i64: 1>, scalar_prefetch = 0 : i64, scratch_operands = 0 : i64, tpu.core_type = #tpu.core_type<tc>, window_params = [{pipeline_mode = #tpu.pipeline_mode<synchronous>, transform_indices = @transform_0, window_bounds = array<i64: 48, 32>}, {pipeline_mode = #tpu.pipeline_mode<synchronous>, transform_indices = @transform_1, window_bounds = array<i64: 48, 32>}, {pipeline_mode = #tpu.pipeline_mode<synchronous>, transform_indices = @transform_2, window_bounds = array<i64: 48, 32>}, {pipeline_mode = #tpu.pipeline_mode<synchronous>, transform_indices = @transform_3, window_bounds = array<i64: 32, 64>}, {pipeline_mode = #tpu.pipeline_mode<synchronous>, transform_indices = @transform_4, window_bounds = array<i64: 32, 128>}, {pipeline_mode = #tpu.pipeline_mode<synchronous>, transform_indices = @transform_5, window_bounds = array<i64: 64, 32>}, {pipeline_mode = #tpu.pipeline_mode<synchronous>, transform_indices = @transform_6, window_bounds = array<i64: 16, 32>}]} {
    %c0 = arith.constant 0 : index
    %c0_0 = arith.constant 0 : index
    %0 = vector.load %arg1[%c0, %c0_0] : memref<48x32xf32, #tpu.memory_space<vmem>>, vector<48x32xf32>
    %cst = arith.constant dense<0.000000e+00> : vector<48xf32>
    %1 = vector.multi_reduction <add>, %0, %cst [1] : vector<48x32xf32> to vector<48xf32>
    %2 = vector.shape_cast %1 : vector<48xf32> to vector<48x1xf32>
    %cst_1 = arith.constant 3.200000e+01 : f32
    %3 = vector.broadcast %cst_1 : f32 to vector<48x1xf32>
    %4 = arith.divf %2, %3 : vector<48x1xf32>
    %5 = vector.broadcast %4 : vector<48x1xf32> to vector<48x32xf32>
    %6 = arith.subf %0, %5 : vector<48x32xf32>
    %7 = arith.mulf %6, %6 : vector<48x32xf32>
    %cst_2 = arith.constant dense<0.000000e+00> : vector<48xf32>
    %8 = vector.multi_reduction <add>, %7, %cst_2 [1] : vector<48x32xf32> to vector<48xf32>
    %9 = vector.shape_cast %8 : vector<48xf32> to vector<48x1xf32>
    %cst_3 = arith.constant 3.200000e+01 : f32
    %10 = vector.broadcast %cst_3 : f32 to vector<48x1xf32>
    %11 = arith.divf %9, %10 : vector<48x1xf32>
    %12 = vector.broadcast %4 : vector<48x1xf32> to vector<48x32xf32>
    %13 = arith.subf %0, %12 : vector<48x32xf32>
    %cst_4 = arith.constant 9.99999974E-6 : f32
    %14 = vector.broadcast %cst_4 : f32 to vector<48x1xf32>
    %15 = arith.addf %11, %14 : vector<48x1xf32>
    %16 = math.rsqrt %15 : vector<48x1xf32>
    %17 = vector.broadcast %16 : vector<48x1xf32> to vector<48x32xf32>
    %18 = arith.mulf %13, %17 : vector<48x32xf32>
    %c0_5 = arith.constant 0 : index
    %c0_6 = arith.constant 0 : index
    %19 = vector.load %arg2[%c0_5, %c0_6] : memref<48x32xf32, #tpu.memory_space<vmem>>, vector<48x32xf32>
    %20 = arith.mulf %18, %19 : vector<48x32xf32>
    %c0_7 = arith.constant 0 : index
    %c0_8 = arith.constant 0 : index
    %21 = vector.load %arg3[%c0_7, %c0_8] : memref<48x32xf32, #tpu.memory_space<vmem>>, vector<48x32xf32>
    %22 = arith.addf %20, %21 : vector<48x32xf32>
    %23 = vector.extract_strided_slice %22 {offsets = [16, 0], sizes = [8, 32], strides = [1, 1]} : vector<48x32xf32> to vector<8x32xf32>
    %24 = vector.extract_strided_slice %22 {offsets = [40, 0], sizes = [8, 32], strides = [1, 1]} : vector<48x32xf32> to vector<8x32xf32>
    %25 = tpu.concatenate %23, %24 in 0 : vector<8x32xf32>, vector<8x32xf32> -> vector<16x32xf32>
    %c0_9 = arith.constant 0 : index
    %c0_10 = arith.constant 0 : index
    %26 = vector.load %arg4[%c0_9, %c0_10] : memref<32x64xf32, #tpu.memory_space<vmem>>, vector<32x64xf32>
    %cst_11 = arith.constant dense<0.000000e+00> : vector<16x64xf32>
    %27 = tpu.matmul %25, %26, %cst_11 {dimension_numbers = #tpu.dot_dimension_numbers<[1], [0], [0], [1], [0, 0, 1, 1], [], []>} : vector<16x32xf32>, vector<32x64xf32>, vector<16x64xf32> -> vector<16x64xf32>
    %cst_12 = arith.constant 2.500000e-01 : f32
    %28 = vector.broadcast %cst_12 : f32 to vector<16x64xf32>
    %29 = arith.mulf %27, %28 : vector<16x64xf32>
    %c0_13 = arith.constant 0 : index
    %c0_14 = arith.constant 0 : index
    %30 = vector.load %arg5[%c0_13, %c0_14] : memref<32x128xf32, #tpu.memory_space<vmem>>, vector<32x128xf32>
    %cst_15 = arith.constant dense<0.000000e+00> : vector<48x128xf32>
    %31 = tpu.matmul %22, %30, %cst_15 {dimension_numbers = #tpu.dot_dimension_numbers<[1], [0], [0], [1], [0, 0, 1, 1], [], []>} : vector<48x32xf32>, vector<32x128xf32>, vector<48x128xf32> -> vector<48x128xf32>
    %32 = vector.shape_cast %29 : vector<16x64xf32> to vector<2x8x64xf32>
    %33 = vector.shape_cast %31 : vector<48x128xf32> to vector<2x24x128xf32>
    %c0_16 = arith.constant 0 : index
    %c0_17 = arith.constant 0 : index
    %34 = vector.load %arg6[%c0_16, %c0_17] : memref<64x32xf32, #tpu.memory_space<vmem>>, vector<64x32xf32>
    %cst_18 = arith.constant 0.000000e+00 : f32
    %35 = vector.broadcast %cst_18 : f32 to vector<16x32xf32>
    %36 = vector.extract_strided_slice %32 {offsets = [0, 0, 0], sizes = [2, 8, 16], strides = [1, 1, 1]} : vector<2x8x64xf32> to vector<2x8x16xf32>
    %37 = vector.extract_strided_slice %33 {offsets = [0, 0, 0], sizes = [2, 24, 16], strides = [1, 1, 1]} : vector<2x24x128xf32> to vector<2x24x16xf32>
    %38 = vector.extract_strided_slice %33 {offsets = [0, 0, 64], sizes = [2, 24, 16], strides = [1, 1, 1]} : vector<2x24x128xf32> to vector<2x24x16xf32>
    "tpu.trace_start"() <{level = 10 : i32, message = "bqd,bkd->bqk"}> : () -> ()
    %cst_19 = arith.constant dense<0.000000e+00> : vector<2x8x24xf32>
    %39 = tpu.matmul %36, %37, %cst_19 {dimension_numbers = #tpu.dot_dimension_numbers<[2], [2], [1], [1], [0, 0, 0, 1, 1, 1], [0], [0]>} : vector<2x8x16xf32>, vector<2x24x16xf32>, vector<2x8x24xf32> -> vector<2x8x24xf32>
    "tpu.trace_stop"() : () -> ()
    %cst_20 = arith.constant dense<0xFF800000> : vector<2x8xf32>
    %40 = vector.multi_reduction <maximumf>, %39, %cst_20 [2] : vector<2x8x24xf32> to vector<2x8xf32>
    %41 = vector.shape_cast %40 : vector<2x8xf32> to vector<2x8x1xf32>
    %42 = vector.broadcast %41 : vector<2x8x1xf32> to vector<2x8x24xf32>
    %43 = arith.subf %39, %42 : vector<2x8x24xf32>
    %44 = math.exp %43 : vector<2x8x24xf32>
    %cst_21 = arith.constant dense<0.000000e+00> : vector<2x8xf32>
    %45 = vector.multi_reduction <add>, %44, %cst_21 [2] : vector<2x8x24xf32> to vector<2x8xf32>
    %46 = vector.shape_cast %45 : vector<2x8xf32> to vector<2x8x1xf32>
    %47 = tpu.reciprocal %46 : vector<2x8x1xf32> -> vector<2x8x1xf32>
    %48 = vector.broadcast %47 : vector<2x8x1xf32> to vector<2x8x24xf32>
    %49 = arith.mulf %44, %48 : vector<2x8x24xf32>
    "tpu.trace_start"() <{level = 10 : i32, message = "bqk,bkd->bqd"}> : () -> ()
    %cst_22 = arith.constant dense<0.000000e+00> : vector<2x8x16xf32>
    %50 = tpu.matmul %49, %38, %cst_22 {dimension_numbers = #tpu.dot_dimension_numbers<[2], [1], [1], [2], [0, 0, 0, 1, 1, 2], [0], [0]>} : vector<2x8x24xf32>, vector<2x24x16xf32>, vector<2x8x16xf32> -> vector<2x8x16xf32>
    "tpu.trace_stop"() : () -> ()
    %51 = vector.shape_cast %50 : vector<2x8x16xf32> to vector<16x16xf32>
    %52 = vector.extract_strided_slice %34 {offsets = [0, 0], sizes = [16, 32], strides = [1, 1]} : vector<64x32xf32> to vector<16x32xf32>
    %cst_23 = arith.constant dense<0.000000e+00> : vector<16x32xf32>
    %53 = tpu.matmul %51, %52, %cst_23 {dimension_numbers = #tpu.dot_dimension_numbers<[1], [0], [0], [1], [0, 0, 1, 1], [], []>} : vector<16x16xf32>, vector<16x32xf32>, vector<16x32xf32> -> vector<16x32xf32>
    %54 = arith.addf %35, %53 : vector<16x32xf32>
    %55 = vector.extract_strided_slice %32 {offsets = [0, 0, 16], sizes = [2, 8, 16], strides = [1, 1, 1]} : vector<2x8x64xf32> to vector<2x8x16xf32>
    %56 = vector.extract_strided_slice %33 {offsets = [0, 0, 16], sizes = [2, 24, 16], strides = [1, 1, 1]} : vector<2x24x128xf32> to vector<2x24x16xf32>
    %57 = vector.extract_strided_slice %33 {offsets = [0, 0, 80], sizes = [2, 24, 16], strides = [1, 1, 1]} : vector<2x24x128xf32> to vector<2x24x16xf32>
    "tpu.trace_start"() <{level = 10 : i32, message = "bqd,bkd->bqk"}> : () -> ()
    %cst_24 = arith.constant dense<0.000000e+00> : vector<2x8x24xf32>
    %58 = tpu.matmul %55, %56, %cst_24 {dimension_numbers = #tpu.dot_dimension_numbers<[2], [2], [1], [1], [0, 0, 0, 1, 1, 1], [0], [0]>} : vector<2x8x16xf32>, vector<2x24x16xf32>, vector<2x8x24xf32> -> vector<2x8x24xf32>
    "tpu.trace_stop"() : () -> ()
    %cst_25 = arith.constant dense<0xFF800000> : vector<2x8xf32>
    %59 = vector.multi_reduction <maximumf>, %58, %cst_25 [2] : vector<2x8x24xf32> to vector<2x8xf32>
    %60 = vector.shape_cast %59 : vector<2x8xf32> to vector<2x8x1xf32>
    %61 = vector.broadcast %60 : vector<2x8x1xf32> to vector<2x8x24xf32>
    %62 = arith.subf %58, %61 : vector<2x8x24xf32>
    %63 = math.exp %62 : vector<2x8x24xf32>
    %cst_26 = arith.constant dense<0.000000e+00> : vector<2x8xf32>
    %64 = vector.multi_reduction <add>, %63, %cst_26 [2] : vector<2x8x24xf32> to vector<2x8xf32>
    %65 = vector.shape_cast %64 : vector<2x8xf32> to vector<2x8x1xf32>
    %66 = tpu.reciprocal %65 : vector<2x8x1xf32> -> vector<2x8x1xf32>
    %67 = vector.broadcast %66 : vector<2x8x1xf32> to vector<2x8x24xf32>
    %68 = arith.mulf %63, %67 : vector<2x8x24xf32>
    "tpu.trace_start"() <{level = 10 : i32, message = "bqk,bkd->bqd"}> : () -> ()
    %cst_27 = arith.constant dense<0.000000e+00> : vector<2x8x16xf32>
    %69 = tpu.matmul %68, %57, %cst_27 {dimension_numbers = #tpu.dot_dimension_numbers<[2], [1], [1], [2], [0, 0, 0, 1, 1, 2], [0], [0]>} : vector<2x8x24xf32>, vector<2x24x16xf32>, vector<2x8x16xf32> -> vector<2x8x16xf32>
    "tpu.trace_stop"() : () -> ()
    %70 = vector.shape_cast %69 : vector<2x8x16xf32> to vector<16x16xf32>
    %71 = vector.extract_strided_slice %34 {offsets = [16, 0], sizes = [16, 32], strides = [1, 1]} : vector<64x32xf32> to vector<16x32xf32>
    %cst_28 = arith.constant dense<0.000000e+00> : vector<16x32xf32>
    %72 = tpu.matmul %70, %71, %cst_28 {dimension_numbers = #tpu.dot_dimension_numbers<[1], [0], [0], [1], [0, 0, 1, 1], [], []>} : vector<16x16xf32>, vector<16x32xf32>, vector<16x32xf32> -> vector<16x32xf32>
    %73 = arith.addf %54, %72 : vector<16x32xf32>
    %74 = vector.extract_strided_slice %32 {offsets = [0, 0, 32], sizes = [2, 8, 16], strides = [1, 1, 1]} : vector<2x8x64xf32> to vector<2x8x16xf32>
    %75 = vector.extract_strided_slice %33 {offsets = [0, 0, 32], sizes = [2, 24, 16], strides = [1, 1, 1]} : vector<2x24x128xf32> to vector<2x24x16xf32>
    %76 = vector.extract_strided_slice %33 {offsets = [0, 0, 96], sizes = [2, 24, 16], strides = [1, 1, 1]} : vector<2x24x128xf32> to vector<2x24x16xf32>
    "tpu.trace_start"() <{level = 10 : i32, message = "bqd,bkd->bqk"}> : () -> ()
    %cst_29 = arith.constant dense<0.000000e+00> : vector<2x8x24xf32>
    %77 = tpu.matmul %74, %75, %cst_29 {dimension_numbers = #tpu.dot_dimension_numbers<[2], [2], [1], [1], [0, 0, 0, 1, 1, 1], [0], [0]>} : vector<2x8x16xf32>, vector<2x24x16xf32>, vector<2x8x24xf32> -> vector<2x8x24xf32>
    "tpu.trace_stop"() : () -> ()
    %cst_30 = arith.constant dense<0xFF800000> : vector<2x8xf32>
    %78 = vector.multi_reduction <maximumf>, %77, %cst_30 [2] : vector<2x8x24xf32> to vector<2x8xf32>
    %79 = vector.shape_cast %78 : vector<2x8xf32> to vector<2x8x1xf32>
    %80 = vector.broadcast %79 : vector<2x8x1xf32> to vector<2x8x24xf32>
    %81 = arith.subf %77, %80 : vector<2x8x24xf32>
    %82 = math.exp %81 : vector<2x8x24xf32>
    %cst_31 = arith.constant dense<0.000000e+00> : vector<2x8xf32>
    %83 = vector.multi_reduction <add>, %82, %cst_31 [2] : vector<2x8x24xf32> to vector<2x8xf32>
    %84 = vector.shape_cast %83 : vector<2x8xf32> to vector<2x8x1xf32>
    %85 = tpu.reciprocal %84 : vector<2x8x1xf32> -> vector<2x8x1xf32>
    %86 = vector.broadcast %85 : vector<2x8x1xf32> to vector<2x8x24xf32>
    %87 = arith.mulf %82, %86 : vector<2x8x24xf32>
    "tpu.trace_start"() <{level = 10 : i32, message = "bqk,bkd->bqd"}> : () -> ()
    %cst_32 = arith.constant dense<0.000000e+00> : vector<2x8x16xf32>
    %88 = tpu.matmul %87, %76, %cst_32 {dimension_numbers = #tpu.dot_dimension_numbers<[2], [1], [1], [2], [0, 0, 0, 1, 1, 2], [0], [0]>} : vector<2x8x24xf32>, vector<2x24x16xf32>, vector<2x8x16xf32> -> vector<2x8x16xf32>
    "tpu.trace_stop"() : () -> ()
    %89 = vector.shape_cast %88 : vector<2x8x16xf32> to vector<16x16xf32>
    %90 = vector.extract_strided_slice %34 {offsets = [32, 0], sizes = [16, 32], strides = [1, 1]} : vector<64x32xf32> to vector<16x32xf32>
    %cst_33 = arith.constant dense<0.000000e+00> : vector<16x32xf32>
    %91 = tpu.matmul %89, %90, %cst_33 {dimension_numbers = #tpu.dot_dimension_numbers<[1], [0], [0], [1], [0, 0, 1, 1], [], []>} : vector<16x16xf32>, vector<16x32xf32>, vector<16x32xf32> -> vector<16x32xf32>
    %92 = arith.addf %73, %91 : vector<16x32xf32>
    %93 = vector.extract_strided_slice %32 {offsets = [0, 0, 48], sizes = [2, 8, 16], strides = [1, 1, 1]} : vector<2x8x64xf32> to vector<2x8x16xf32>
    %94 = vector.extract_strided_slice %33 {offsets = [0, 0, 48], sizes = [2, 24, 16], strides = [1, 1, 1]} : vector<2x24x128xf32> to vector<2x24x16xf32>
    %95 = vector.extract_strided_slice %33 {offsets = [0, 0, 112], sizes = [2, 24, 16], strides = [1, 1, 1]} : vector<2x24x128xf32> to vector<2x24x16xf32>
    "tpu.trace_start"() <{level = 10 : i32, message = "bqd,bkd->bqk"}> : () -> ()
    %cst_34 = arith.constant dense<0.000000e+00> : vector<2x8x24xf32>
    %96 = tpu.matmul %93, %94, %cst_34 {dimension_numbers = #tpu.dot_dimension_numbers<[2], [2], [1], [1], [0, 0, 0, 1, 1, 1], [0], [0]>} : vector<2x8x16xf32>, vector<2x24x16xf32>, vector<2x8x24xf32> -> vector<2x8x24xf32>
    "tpu.trace_stop"() : () -> ()
    %cst_35 = arith.constant dense<0xFF800000> : vector<2x8xf32>
    %97 = vector.multi_reduction <maximumf>, %96, %cst_35 [2] : vector<2x8x24xf32> to vector<2x8xf32>
    %98 = vector.shape_cast %97 : vector<2x8xf32> to vector<2x8x1xf32>
    %99 = vector.broadcast %98 : vector<2x8x1xf32> to vector<2x8x24xf32>
    %100 = arith.subf %96, %99 : vector<2x8x24xf32>
    %101 = math.exp %100 : vector<2x8x24xf32>
    %cst_36 = arith.constant dense<0.000000e+00> : vector<2x8xf32>
    %102 = vector.multi_reduction <add>, %101, %cst_36 [2] : vector<2x8x24xf32> to vector<2x8xf32>
    %103 = vector.shape_cast %102 : vector<2x8xf32> to vector<2x8x1xf32>
    %104 = tpu.reciprocal %103 : vector<2x8x1xf32> -> vector<2x8x1xf32>
    %105 = vector.broadcast %104 : vector<2x8x1xf32> to vector<2x8x24xf32>
    %106 = arith.mulf %101, %105 : vector<2x8x24xf32>
    "tpu.trace_start"() <{level = 10 : i32, message = "bqk,bkd->bqd"}> : () -> ()
    %cst_37 = arith.constant dense<0.000000e+00> : vector<2x8x16xf32>
    %107 = tpu.matmul %106, %95, %cst_37 {dimension_numbers = #tpu.dot_dimension_numbers<[2], [1], [1], [2], [0, 0, 0, 1, 1, 2], [0], [0]>} : vector<2x8x24xf32>, vector<2x24x16xf32>, vector<2x8x16xf32> -> vector<2x8x16xf32>
    "tpu.trace_stop"() : () -> ()
    %108 = vector.shape_cast %107 : vector<2x8x16xf32> to vector<16x16xf32>
    %109 = vector.extract_strided_slice %34 {offsets = [48, 0], sizes = [16, 32], strides = [1, 1]} : vector<64x32xf32> to vector<16x32xf32>
    %cst_38 = arith.constant dense<0.000000e+00> : vector<16x32xf32>
    %110 = tpu.matmul %108, %109, %cst_38 {dimension_numbers = #tpu.dot_dimension_numbers<[1], [0], [0], [1], [0, 0, 1, 1], [], []>} : vector<16x16xf32>, vector<16x32xf32>, vector<16x32xf32> -> vector<16x32xf32>
    %111 = arith.addf %92, %110 : vector<16x32xf32>
    %c0_39 = arith.constant 0 : index
    %c0_40 = arith.constant 0 : index
    %112 = vector.load %arg7[%c0_39, %c0_40] : memref<16x32xf32, #tpu.memory_space<vmem>>, vector<16x32xf32>
    tpu.vector_store %arg7[%c0_39, %c0_40], %111 {strides = array<i32>} : memref<16x32xf32, #tpu.memory_space<vmem>>, vector<16x32xf32>,
    return
  }
  func.func @transform_0(%arg0: i32) -> (i32, i32) {
    %c0_i32 = arith.constant 0 : i32
    %c0_i32_0 = arith.constant 0 : i32
    %c0_i32_1 = arith.constant 0 : i32
    return %c0_i32, %c0_i32_0 : i32, i32
  }
  func.func @transform_1(%arg0: i32) -> (i32, i32) {
    %c0_i32 = arith.constant 0 : i32
    %c0_i32_0 = arith.constant 0 : i32
    %c0_i32_1 = arith.constant 0 : i32
    return %c0_i32, %c0_i32_0 : i32, i32
  }
  func.func @transform_2(%arg0: i32) -> (i32, i32) {
    %c0_i32 = arith.constant 0 : i32
    %c0_i32_0 = arith.constant 0 : i32
    %c0_i32_1 = arith.constant 0 : i32
    return %c0_i32, %c0_i32_0 : i32, i32
  }
  func.func @transform_3(%arg0: i32) -> (i32, i32) {
    %c0_i32 = arith.constant 0 : i32
    %c0_i32_0 = arith.constant 0 : i32
    %c0_i32_1 = arith.constant 0 : i32
    return %c0_i32, %c0_i32_0 : i32, i32
  }
  func.func @transform_4(%arg0: i32) -> (i32, i32) {
    %c0_i32 = arith.constant 0 : i32
    %c0_i32_0 = arith.constant 0 : i32
    %c0_i32_1 = arith.constant 0 : i32
    return %c0_i32, %c0_i32_0 : i32, i32
  }
  func.func @transform_5(%arg0: i32) -> (i32, i32) {
    %c0_i32 = arith.constant 0 : i32
    %c0_i32_0 = arith.constant 0 : i32
    %c0_i32_1 = arith.constant 0 : i32
    return %c0_i32, %c0_i32_0 : i32, i32
  }
  func.func @transform_6(%arg0: i32) -> (i32, i32) {
    %c0_i32 = arith.constant 0 : i32
    %c0_i32_0 = arith.constant 0 : i32
    %c0_i32_1 = arith.constant 0 : i32
    return %c0_i32, %c0_i32_0 : i32, i32
  }
}

</mosaic_0001>

<bundles_post_ra>
// kernel: tpu_custom_call.1
= control target key start
LH: loop header
LB: loop body
LE: loop exit
PB: predicated region body
PF: predicated region fallthrough
CT: control target
= control target key end

     0   :  { %vm30_vm0 = vcmask 261120   ;;  %s1756_s0 = inlined_call_operand.vmem [shape: f32[48,32], index: 0, kind: input, shape index: {}]   ;;  %s1757_s1 = inlined_call_operand.vmem [shape: f32[48,32], index: 1, kind: input, shape index: {}]   ;;  %s1758_s2 = inlined_call_operand.vmem [shape: f32[48,32], index: 2, kind: input, shape index: {}]   ;;  %s1759_s3 = inlined_call_operand.vmem [shape: f32[32,64], index: 3, kind: input, shape index: {}]   ;;  %s1760_s4 = inlined_call_operand.vmem [shape: f32[32,128], index: 4, kind: input, shape index: {}]   ;;  %s1761_s5 = inlined_call_operand.vmem [shape: f32[64,32], index: 5, kind: input, shape index: {}]   ;;  %s1762_s6 = inlined_call_operand.hbm [shape: f32[16,32], index: 6, kind: output, shape index: {}]  }
   0x1   :  { %v24_v0 = vld [vmem:[%s1756_s0] sm:$0xff]  ;;  %v26_v1 = vld [vmem:[%s1756_s0 + $0x10] sm:$0xff] }
   0x2   :  { %v31_v2 = vsel %vm30_vm0, %v24_v0, 0.0  ;;  %v37_v3 = vsel %vm30_vm0, %v26_v1, 0.0 }
   0x3   :  { %11 = vsyncpa [#allocation3], 0  ;;  %32 = vadd.xlane.f32.xlu0 %v31_v2  ;;  %38 = vadd.xlane.f32.xlu1 %v37_v3  ;;  %v25_v4 = vld [vmem:[%s1756_s0 + $0x8] sm:$0xff]  ;;  %v1344_v6 = vmov 32.0   ;;  %v27_v8 = vld [vmem:[%s1756_s0 + $0x18] sm:$0xff]  ;;  %s1345_s19 = smov 112  }
   0x4   :  { %v34_v5 = vsel %vm30_vm0, %v25_v4, 0.0  ;;  %1272 = vrcp.f32 %v1344_v6  ;;  %v40_v9 = vsel %vm30_vm0, %v27_v8, 0.0  ;;  %v28_v24 = vld [vmem:[%s1756_s0 + $0x20] sm:$0xff]  ;;  %v1433_v32 = vld [vmem:[%s1756_s0 + $0x28] sm:$0xff]  ;;  %v232_v39 = vld [vmem:[%s1760_s4 + $0x18] sm:$0xff]  ;;  %s1349_s22 = smov 32  }
   0x5   :  { %v43_v28 = vsel %vm30_vm0, %v28_v24, 0.0  ;;  %v46_v33 = vsel %vm30_vm0, %v1433_v32, 0.0  ;;  %257 = vmatpush.msra.mxu1 %v232_v39  ;;  %v231_v40 = vld [vmem:[%s1760_s4 + $0x10] sm:$0xff]  ;;  %v230_v41 = vld [vmem:[%s1760_s4 + $0x8] sm:$0xff]  ;;  %v229_v42 = vld [vmem:[%s1760_s4] sm:$0xff]  ;;  %s1348_s4 = smov 96  }
   0x6   :  { %v197_v46 = vld [vmem:[%s1759_s3 + $0x18] sm:$0xff]  ;;  %v196_v47 = vld [vmem:[%s1759_s3 + $0x10] sm:$0xff]  ;;  %v195_v48 = vld [vmem:[%s1759_s3 + $0x8] sm:$0xff]  ;;  %s1350_s30 = smov 80   ;;  %s1351_s0 = smov 16  }
   0x7   :  { %258 = vmatpush.msra.mxu1 %v231_v40  ;;  %216 = vmatpush.msra.mxu0 %v197_v46  ;;  %v194_v53 = vld [vmem:[%s1759_s3] sm:$0xff]  ;;  %s1352_s15 = smov [#allocation2]   ;;  %s1146_s18 = sshll.u32 %s1762_s6, 4  ;;  %s1147_s18 = int_to_ptr.hbm [resolvable:$true] %s1146_s18 }
   0x8   :  { %s1144_s16 = sshll.u32 %s1352_s15, 4  ;;  %s1354_s20 = smov 8   ;;  %s1145_s16 = int_to_ptr.vmem [resolvable:$true] %s1144_s16 }
   0x9   :  { %259 = vmatpush.msra.mxu1 %v230_v41  ;;  %217 = vmatpush.msra.mxu0 %v196_v47 }
   0xa   :  { %v1273_v7 = vpop.eup %1272 }
   0xb   :  { %35 = vadd.xlane.f32.xlu0 %v34_v5  ;;  %v50_v10 = vmul.f32 32.0, %v1273_v7  ;;  %vm54_vm1 = vweird.f32 %v1273_v7  ;;  %260 = vmatpush.msra.mxu1 %v229_v42 }
   0xc   :  { %218 = vmatpush.msra.mxu0 %v195_v48 }
   0xd   :  { %v51_v11 = vsub.f32 1.0, %v50_v10 }
   0xe   :  { %219 = vmatpush.msra.mxu0 %v194_v53  ;;  %v185_v53 = vld [vmem:[%s1758_s2 + $0x18] sm:$0xff] }
   0xf   :  { %v52_v12 = vmul.f32 %v1273_v7, %v51_v11  ;;  %v182_v11 = vld [vmem:[%s1758_s2] sm:$0xff] }
  0x11   :  { %v53_v13 = vadd.f32 %v1273_v7, %v52_v12 }
  0x13   :  { %41 = vadd.xlane.f32.xlu0 %v40_v9  ;;  %v1406_v14 = vsel %vm54_vm1, %v1273_v7, %v53_v13  ;;  %v170_v7 = vld [vmem:[%s1757_s1] sm:$0xff] }
  0x76   :  { %v33_v15 = vpop.xlane.xlu0 %32  ;;  %v39_v19 = vpop.xlane.xlu1 %38 }
  0x77   :  { %v56_v16 = vmul.f32 %v1406_v14, %v33_v15  ;;  %v58_v23 = vmul.f32 %v1406_v14, %v39_v19 }
  0x79   :  { %v1409_v17 = vsub.f32 %v24_v0, %v56_v16  ;;  %v1421_v26 = vsub.f32 %v26_v1, %v58_v23 }
  0x7b   :  { %v68_v18 = vmul.f32 %v1409_v17, %v1409_v17  ;;  %v70_v30 = vmul.f32 %v1421_v26, %v1421_v26 }
  0x7d   :  { %v74_v20 = vsel %vm30_vm0, %v68_v18, 0.0  ;;  %v80_v31 = vsel %vm30_vm0, %v70_v30, 0.0  ;;  %v183_v30 = vld [vmem:[%s1758_s2 + $0x8] sm:$0xff] }
  0x7e   :  { %75 = vadd.xlane.f32.xlu1 %v74_v20  ;;  %v36_v21 = vpop.xlane.xlu0 %35 }
  0x7f   :  { %v57_v22 = vmul.f32 %v1406_v14, %v36_v21 }
  0x81   :  { %v1419_v25 = vsub.f32 %v25_v4, %v57_v22 }
  0x83   :  { %v69_v27 = vmul.f32 %v1419_v25, %v1419_v25 }
  0x85   :  { %v77_v29 = vsel %vm30_vm0, %v69_v27, 0.0 }
  0x86   :  { %78 = vadd.xlane.f32.xlu2 %v77_v29  ;;  %44 = vadd.xlane.f32.xlu1 %v43_v28  ;;  %v42_v34 = vpop.xlane.xlu0 %41 }
  0x87   :  { %v59_v35 = vmul.f32 %v1406_v14, %v42_v34 }
  0x89   :  { %v1438_v36 = vsub.f32 %v27_v8, %v59_v35 }
  0x8b   :  { %v71_v37 = vmul.f32 %v1438_v36, %v1438_v36 }
  0x8d   :  { %v83_v38 = vsel %vm30_vm0, %v71_v37, 0.0 }
  0x8e   :  { %81 = vadd.xlane.f32.xlu2 %v80_v31  ;;  %84 = vadd.xlane.f32.xlu0 %v83_v38  ;;  %v184_v38 = vld [vmem:[%s1758_s2 + $0x10] sm:$0xff] }
  0x96   :  { %47 = vadd.xlane.f32.xlu2 %v46_v33 }
  0xf1   :  { %v76_v43 = vpop.xlane.xlu1 %75 }
  0xf2   :  { %v92_v44 = vmul.f32 %v76_v43, %v1406_v14 }
  0xf4   :  { %v98_v45 = vadd.f32 1e-05, %v92_v44 }
  0xf6   :  { %1274 = vrsqrt.f32 %v98_v45  ;;  %vm110_vm3 = vweird.f32 %v98_v45 }
  0xf9   :  { %v79_v49 = vpop.xlane.xlu2 %78  ;;  %v45_v50 = vpop.xlane.xlu1 %44 }
  0xfa   :  { %v93_v51 = vmul.f32 %v79_v49, %v1406_v14  ;;  %v60_v52 = vmul.f32 %v1406_v14, %v45_v50 }
  0xfc   :  { %v1275_v54 = vpop.eup %1274  ;;  %v99_v55 = vadd.f32 1e-05, %v93_v51  ;;  %v1470_v56 = vsub.f32 %v28_v24, %v60_v52  ;;  %v171_v24 = vld [vmem:[%s1757_s1 + $0x8] sm:$0xff]  ;;  %v173_v51 = vld [vmem:[%s1757_s1 + $0x18] sm:$0xff] }
  0xfd   :  { %v105_v57 = vmul.f32 %v1275_v54, %v98_v45  ;;  %vm111_vm2 = vweird.f32 %v1275_v54 }
  0xfe   :  { %1276 = vrsqrt.f32 %v99_v55  ;;  %v72_v58 = vmul.f32 %v1470_v56, %v1470_v56  ;;  %vm112_vm4 = vmor %vm110_vm3, %vm111_vm2  ;;  %vm120_vm6 = vweird.f32 %v99_v55 }
  0xff   :  { %v106_v59 = vmul.f32 %v1275_v54, %v105_v57 }
 0x100   :  { %v86_v60 = vsel %vm30_vm0, %v72_v58, 0.0 }
 0x101   :  { %v107_v61 = vmul.f32 0.5, %v106_v59  ;;  %v82_v62 = vpop.xlane.xlu2 %81  ;;  %87 = vadd.xlane.f32.xlu1 %v86_v60  ;;  %v85_v41 = vpop.xlane.xlu0 %84 }
 0x102   :  { %v94_v63 = vmul.f32 %v82_v62, %v1406_v14  ;;  %v95_v42 = vmul.f32 %v85_v41, %v1406_v14 }
 0x103   :  { %v108_v0 = vsub.f32 1.5, %v107_v61 }
 0x104   :  { %v1277_v1 = vpop.eup %1276  ;;  %v100_v2 = vadd.f32 1e-05, %v94_v63  ;;  %v101_v43 = vadd.f32 1e-05, %v95_v42 }
 0x105   :  { %v109_v3 = vmul.f32 %v1275_v54, %v108_v0  ;;  %v115_v4 = vmul.f32 %v1277_v1, %v99_v55  ;;  %vm121_vm5 = vweird.f32 %v1277_v1 }
 0x106   :  { %1278 = vrsqrt.f32 %v100_v2  ;;  %vm122_vm7 = vmor %vm120_vm6, %vm121_vm5  ;;  %vm130_vm9 = vweird.f32 %v100_v2  ;;  %vm140_vm11 = vweird.f32 %v101_v43  ;;  %vm288_vm5 = vcmask 130048  }
 0x107   :  { %v113_v5 = vsel %vm112_vm4, %v1275_v54, %v109_v3  ;;  %v116_v6 = vmul.f32 %v1277_v1, %v115_v4  ;;  %1280 = vrsqrt.f32 %v101_v43  ;;  %v174_v4 = vld [vmem:[%s1757_s1 + $0x20] sm:$0xff]  ;;  %vm353_vm6 = vcmask 195584  }
 0x108   :  { %v164_v8 = vmul.f32 %v113_v5, %v1409_v17 }
 0x109   :  { %v117_v9 = vmul.f32 0.5, %v116_v6  ;;  %v48_v10 = vpop.xlane.xlu2 %47 }
 0x10a   :  { %v61_v12 = vmul.f32 %v1406_v14, %v48_v10  ;;  %v176_v13 = vmul.f32 %v170_v7, %v164_v8  ;;  %v186_v7 = vld [vmem:[%s1758_s2 + $0x20] sm:$0xff] }
 0x10b   :  { %v118_v15 = vsub.f32 1.5, %v117_v9 }
 0x10c   :  { %v1279_v16 = vpop.eup %1278  ;;  %v1485_v18 = vsub.f32 %v1433_v32, %v61_v12  ;;  %v188_v19 = vadd.f32 %v182_v11, %v176_v13 }
 0x10d   :  { %v119_v20 = vmul.f32 %v1277_v1, %v118_v15  ;;  %v125_v21 = vmul.f32 %v1279_v16, %v100_v2  ;;  %vm131_vm8 = vweird.f32 %v1279_v16  ;;  %v1281_v44 = vpop.eup %1280 }
 0x10e   :  { %1160 = vmatmul.msk.f32.vlgmr.msra.gmra.mxu1 %vm30_vm0, %v188_v19  ;;  %v73_v17 = vmul.f32 %v1485_v18, %v1485_v18  ;;  %vm132_vm10 = vmor %vm130_vm9, %vm131_vm8  ;;  %v135_v45 = vmul.f32 %v1281_v44, %v101_v43  ;;  %vm141_vm12 = vweird.f32 %v1281_v44  ;;  %v175_v19 = vld [vmem:[%s1757_s1 + $0x28] sm:$0xff] }
 0x10f   :  { %v123_v22 = vsel %vm122_vm7, %v1277_v1, %v119_v20  ;;  %v126_v23 = vmul.f32 %v1279_v16, %v125_v21  ;;  %vm142_vm13 = vmor %vm140_vm11, %vm141_vm12 }
 0x110   :  { %v89_v27 = vsel %vm30_vm0, %v73_v17, 0.0  ;;  %v165_v28 = vmul.f32 %v123_v22, %v1419_v25  ;;  %v172_v25 = vld [vmem:[%s1757_s1 + $0x10] sm:$0xff]  ;;  %v136_v46 = vmul.f32 %v1281_v44, %v135_v45  ;;  %v187_v22 = vld [vmem:[%s1758_s2 + $0x28] sm:$0xff]  ;;  %s1346_s1 = smov 64   ;;  %s1347_s2 = smov 48  }
 0x111   :  { %v127_v29 = vmul.f32 0.5, %v126_v23  ;;  %90 = vadd.xlane.f32.xlu2 %v89_v27 }
 0x112   :  { %v177_v31 = vmul.f32 %v171_v24, %v165_v28  ;;  %v137_v47 = vmul.f32 0.5, %v136_v46 }
 0x113   :  { %v128_v32 = vsub.f32 1.5, %v127_v29 }
 0x114   :  { %v189_v33 = vadd.f32 %v183_v30, %v177_v31 }
 0x115   :  { %v129_v34 = vmul.f32 %v1279_v16, %v128_v32 }
 0x116   :  { %1161 = vmatmul.msk.f32.gmra.mxu1 %vm30_vm0, %v189_v33 }
 0x117   :  { %v133_v35 = vsel %vm132_vm10, %v1279_v16, %v129_v34 }
 0x118   :  { %v166_v37 = vmul.f32 %v133_v35, %v1421_v26  ;;  %v138_v26 = vsub.f32 1.5, %v137_v47 }
 0x11a   :  { %v178_v39 = vmul.f32 %v172_v25, %v166_v37  ;;  %v139_v48 = vmul.f32 %v1281_v44, %v138_v26 }
 0x11c   :  { %v190_v40 = vadd.f32 %v184_v38, %v178_v39  ;;  %v143_v49 = vsel %vm142_vm13, %v1281_v44, %v139_v48 }
 0x11d   :  { %v167_v50 = vmul.f32 %v143_v49, %v1438_v36 }
 0x11e   :  { %1158 = vmatmul.msk.f32.vlgmr.msra.gmra.mxu0 %vm30_vm0, %v190_v40  ;;  %1162 = vmatmul.msk.f32.gmra.mxu1 %vm30_vm0, %v190_v40 }
 0x11f   :  { %v179_v52 = vmul.f32 %v173_v51, %v167_v50 }
 0x121   :  { %v191_v54 = vadd.f32 %v185_v53, %v179_v52 }
 0x126   :  { %1163 = vmatmul.msk.f32.gmra.mxu1 %vm30_vm0, %v191_v54 }
 0x174   :  { %v88_v55 = vpop.xlane.xlu1 %87 }
 0x175   :  { %v96_v57 = vmul.f32 %v88_v55, %v1406_v14 }
 0x177   :  { %v102_v58 = vadd.f32 1e-05, %v96_v57 }
 0x179   :  { %1282 = vrsqrt.f32 %v102_v58  ;;  %vm150_vm14 = vweird.f32 %v102_v58 }
 0x17f   :  { %v1283_v59 = vpop.eup %1282 }
 0x180   :  { %v145_v60 = vmul.f32 %v1283_v59, %v102_v58  ;;  %vm151_vm15 = vweird.f32 %v1283_v59 }
 0x181   :  { %vm152_vm1 = vmor %vm150_vm14, %vm151_vm15 }
 0x182   :  { %v146_v36 = vmul.f32 %v1283_v59, %v145_v60 }
 0x184   :  { %v147_v61 = vmul.f32 0.5, %v146_v36  ;;  %v91_v62 = vpop.xlane.xlu2 %90 }
 0x185   :  { %v97_v63 = vmul.f32 %v91_v62, %v1406_v14 }
 0x186   :  { %v148_v0 = vsub.f32 1.5, %v147_v61 }
 0x187   :  { %v103_v1 = vadd.f32 1e-05, %v97_v63 }
 0x188   :  { %v149_v2 = vmul.f32 %v1283_v59, %v148_v0 }
 0x189   :  { %1284 = vrsqrt.f32 %v103_v1  ;;  %vm160_vm2 = vweird.f32 %v103_v1 }
 0x18a   :  { %v153_v3 = vsel %vm152_vm1, %v1283_v59, %v149_v2 }
 0x18b   :  { %v1522_v5 = vpop.f32.mrf.mxu1  ;;  %v168_v6 = vmul.f32 %v153_v3, %v1470_v56 }
 0x18d   :  { %v180_v8 = vmul.f32 %v174_v4, %v168_v6 }
 0x18f   :  { %v1285_v14 = vpop.eup %1284  ;;  %v192_v9 = vadd.f32 %v186_v7, %v180_v8 }
 0x190   :  { %v155_v10 = vmul.f32 %v1285_v14, %v103_v1  ;;  %vm161_vm3 = vweird.f32 %v1285_v14 }
 0x191   :  { %1164 = vmatmul.msk.f32.gmra.mxu1 %vm30_vm0, %v192_v9  ;;  %vm162_vm4 = vmor %vm160_vm2, %vm161_vm3 }
 0x192   :  { %v156_v11 = vmul.f32 %v1285_v14, %v155_v10 }
 0x193   :  { %v1529_v12 = vpop.f32.mrf.mxu1 }
 0x194   :  { %v157_v13 = vmul.f32 0.5, %v156_v11 }
 0x196   :  { %v158_v15 = vsub.f32 1.5, %v157_v13 }
 0x198   :  { %v159_v16 = vmul.f32 %v1285_v14, %v158_v15 }
 0x19a   :  { %v163_v56 = vsel %vm162_vm4, %v1285_v14, %v159_v16 }
 0x19b   :  { %v1534_v20 = vpop.f32.mrf.mxu1  ;;  %v169_v21 = vmul.f32 %v163_v56, %v1485_v18  ;;  %v221_v24 = vpop.f32.mrf.mxu0 }
 0x19c   :  { %1166 = vmatpush.xpose.msk.msra.mxu2 %vm288_vm5, %v1534_v20  ;;  %472 = vrot.lane.b32.xlu2 %v1534_v20, %s1345_s19  ;;  %v1543_v17 = vpack.i.bf16 %v1529_v12, %v1534_v20  ;;  %v1554_v27 = vmul.f32 0.25, %v221_v24 }
 0x19d   :  { %v181_v23 = vmul.f32 %v175_v19, %v169_v21 }
 0x19e   :  { %1228 = vrot.lane.b32.xlu1 %v1543_v17, %s1346_s1 }
 0x19f   :  { %v193_v18 = vadd.f32 %v187_v22, %v181_v23 }
 0x1a0   :  { %1167 = vmatpush.xpose.msk.msra.mxu2 %vm288_vm5, %v1529_v12 }
 0x1a1   :  { %1165 = vmatmul.msk.f32.gmra.mxu1 %vm30_vm0, %v193_v18  ;;  %1159 = vmatmul.msk.f32.gmra.mxu0 %vm30_vm0, %v193_v18 }
 0x1a3   :  { %v1566_v28 = vpop.f32.mrf.mxu1 }
 0x1a4   :  { %1168 = vmatpush.xpose.msk.msra.mxu2 %vm288_vm5, %v1522_v5  ;;  %468 = vrot.lane.b32.xlu2 %v1522_v5, %s1345_s19 }
 0x1a6   :  { %466 = vrot.lane.b32.xlu1 %v1554_v27, %s1345_s19 }
 0x1a7   :  { %1169 = vmatmul.msk.f32.vlgmr.msra.gmra.mxu2 %vm288_vm5, %v1554_v27 }
 0x1ac   :  { %402 = vrot.lane.b32.xlu2 %v1522_v5, %s1346_s1 }
 0x1b4   :  { %504 = vrot.lane.b32.xlu2 %v1566_v28, %s1345_s19 }
 0x1f6   :  { %v473_v29 = vpop.permute.xlu2 %472 }
 0x1f7   :  { %1176 = vmatpush.xpose.msk.msrb.mxu0 %vm288_vm5, %v473_v29 }
 0x1fe   :  { %v469_v30 = vpop.permute.xlu2 %468 }
 0x206   :  { %v403_v35 = vpop.permute.xlu2 %402 }
 0x20e   :  { %v1571_v34 = vpop.f32.mrf.mxu1  ;;  %v505_v51 = vpop.permute.xlu2 %504 }
 0x210   :  { %v1229_v31 = vpop.permute.xlu1 %1228 }
 0x211   :  { %v1230_v32 = vunpack.i.l.bf16 %v1229_v31  ;;  %v1231_v33 = vunpack.i.h.bf16 %v1229_v31 }
 0x213   :  { %427 = vmatpush.msrb.mxu2 %v1230_v32 }
 0x215   :  { %428 = vmatpush.msrb.mxu2 %v1231_v33 }
 0x217   :  { %429 = vmatpush.msrb.mxu2 %v403_v35 }
 0x218   :  { %v467_v48 = vpop.permute.xlu1 %466 }
 0x21e   :  { %v1573_v25 = vpop.f32.mrf.mxu1  ;;  %v224_v37 = vpop.f32.mrf.mxu0 }
 0x21f   :  { %1170 = vmatpush.xpose.msk.msra.mxu3 %vm288_vm5, %v1573_v25  ;;  %v1579_v38 = vmul.f32 0.25, %v224_v37  ;;  %v1232_v19 = vpack.i.bf16 %v1571_v34, %v1573_v25 }
 0x223   :  { %1171 = vmatpush.xpose.msk.msra.mxu3 %vm288_vm5, %v1571_v34 }
 0x227   :  { %1172 = vmatpush.xpose.msk.msra.mxu3 %vm288_vm5, %v1566_v28 }
 0x22a   :  { %v318_v39 = vpop.f32.mrf.mxu2  ;;  %1173 = vmatmul.msk.f32.vlgmr.msra.gmra.mxu3 %vm288_vm5, %v1579_v38 }
 0x22b   :  { %v354_v40 = vsel %vm353_vm6, %v318_v39, -inf }
 0x22c   :  { %355 = vmax.xlane.f32.xlu0 %v354_v40 }
 0x240   :  { %470 = vrot.lane.b32.xlu0 %v1529_v12, %s1345_s19 }
 0x248   :  { %508 = vrot.lane.b32.xlu0 %v1573_v25, %s1345_s19 }
 0x250   :  { %506 = vrot.lane.b32.xlu0 %v1571_v34, %s1345_s19 }
 0x29f   :  { %v356_v41 = vpop.xlane.xlu0 %355 }
 0x2a0   :  { %v360_v42 = vsub.f32 %v318_v39, %v356_v41 }
 0x2a2   :  { %v362_v43 = vmul.f32 1.442695, %v360_v42 }
 0x2a4   :  { %1286 = vpow2.f32 %v362_v43 }
 0x2aa   :  { %v1287_v44 = vpop.eup %1286 }
 0x2ab   :  { %v366_v45 = vsel %vm353_vm6, %v1287_v44, 0.0 }
 0x2ac   :  { %367 = vadd.xlane.f32.xlu1 %v366_v45 }
 0x2ad   :  { %v350_v46 = vpop.f32.mrf.mxu3 }
 0x2ae   :  { %v357_v47 = vsel %vm353_vm6, %v350_v46, -inf }
 0x2af   :  { %358 = vmax.xlane.f32.xlu0 %v357_v47 }
 0x2b2   :  { %v471_v26 = vpop.permute.xlu0 %470 }
 0x2b3   :  { %1177 = vmatpush.xpose.msk.msrb.mxu0 %vm288_vm5, %v471_v26 }
 0x2b7   :  { %1178 = vmatpush.xpose.msk.msrb.mxu0 %vm288_vm5, %v469_v30 }
 0x2ba   :  { %1179 = vmatmul.msk.f32.vlgmr.msrb.gmra.mxu0 %vm288_vm5, %v467_v48  ;;  %v509_v49 = vpop.permute.xlu0 %508 }
 0x2bb   :  { %1180 = vmatpush.xpose.msk.msra.mxu2 %vm288_vm5, %v509_v49 }
 0x2c2   :  { %v507_v50 = vpop.permute.xlu0 %506 }
 0x2c3   :  { %1181 = vmatpush.xpose.msk.msra.mxu2 %vm288_vm5, %v507_v50 }
 0x2c5   :  { %502 = vrot.lane.b32.xlu1 %v1579_v38, %s1345_s19  ;;  %s1353_s19 = smov 128  }
 0x2c7   :  { %1182 = vmatpush.xpose.msk.msra.mxu2 %vm288_vm5, %v505_v51 }
 0x31f   :  { %v368_v52 = vpop.xlane.xlu1 %367 }
 0x320   :  { %1288 = vrcp.f32 %v368_v52  ;;  %v383_v60 = vand.u32 2147483648, %v368_v52  ;;  %v381_v61 = vand.u32 2147483647, %v368_v52  ;;  %vm377_vm8 = vweird.f32 %v368_v52 }
 0x322   :  { %v359_v53 = vpop.xlane.xlu0 %358  ;;  %v384_v0 = vor.u32 1.1754944e-38, %v383_v60  ;;  %vm382_vm10 = vcmp.eq.f32.partialorder %v381_v61, 8.507059e+37 }
 0x323   :  { %v361_v54 = vsub.f32 %v350_v46, %v359_v53 }
 0x325   :  { %v364_v55 = vmul.f32 1.442695, %v361_v54 }
 0x326   :  { %v1289_v57 = vpop.eup %1288 }
 0x327   :  { %v373_v58 = vmul.f32 %v1289_v57, %v368_v52  ;;  %1290 = vpow2.f32 %v364_v55  ;;  %vm378_vm7 = vweird.f32 %v1289_v57  ;;  %v281_v55 = vld [vmem:[%s1761_s5 + $0x8] sm:$0xff] }
 0x328   :  { %vm379_vm9 = vmor %vm377_vm8, %vm378_vm7 }
 0x329   :  { %v374_v59 = vsub.f32 1.0, %v373_v58 }
 0x32b   :  { %v375_v36 = vmul.f32 %v1289_v57, %v374_v59 }
 0x32d   :  { %v1602_v62 = vpop.eup %1290  ;;  %v376_v63 = vadd.f32 %v1289_v57, %v375_v36 }
 0x32e   :  { %v369_v1 = vsel %vm353_vm6, %v1602_v62, 0.0 }
 0x32f   :  { %370 = vadd.xlane.f32.xlu0 %v369_v1  ;;  %v380_v2 = vsel %vm379_vm9, %v1289_v57, %v376_v63  ;;  %v280_v57 = vld [vmem:[%s1761_s5] sm:$0xff] }
 0x330   :  { %v385_v3 = vsel %vm382_vm10, %v384_v0, %v380_v2 }
 0x331   :  { %v400_v4 = vmul.f32 %v1287_v44, %v385_v3 }
 0x333   :  { %1174 = vmatmul.msk.f32.vlgmr.msrb.gmra.mxu2 %vm353_vm6, %v400_v4 }
 0x337   :  { %v499_v6 = vpop.f32.mrf.mxu0  ;;  %v503_v8 = vpop.permute.xlu1 %502 }
 0x338   :  { %v538_v7 = vsel %vm353_vm6, %v499_v6, -inf }
 0x339   :  { %539 = vmax.xlane.f32.xlu2 %v538_v7 }
 0x33b   :  { %1183 = vmatmul.msk.f32.vlgmr.msra.gmra.mxu2 %vm288_vm5, %v503_v8 }
 0x343   :  { %434 = vrot.lane.b32.xlu0 %v1566_v28, %s1346_s1 }
 0x34b   :  { %586 = vrot.lane.b32.xlu0 %v1522_v5, %s1347_s2 }
 0x353   :  { %618 = vrot.lane.b32.xlu0 %v1566_v28, %s1347_s2 }
 0x35b   :  { %746 = vrot.lane.b32.xlu0 %v1566_v28, %s1348_s4 }
 0x363   :  { %712 = vrot.lane.b32.xlu0 %v1529_v12, %s1348_s4 }
 0x3a2   :  { %v371_v21 = vpop.xlane.xlu0 %370 }
 0x3a3   :  { %v397_v39 = vand.u32 2147483648, %v371_v21  ;;  %vm391_vm12 = vweird.f32 %v371_v21  ;;  %v395_v40 = vand.u32 2147483647, %v371_v21 }
 0x3a5   :  { %v398_v43 = vor.u32 1.1754944e-38, %v397_v39  ;;  %vm396_vm14 = vcmp.eq.f32.partialorder %v395_v40, 8.507059e+37 }
 0x3ac   :  { %v540_v14 = vpop.xlane.xlu2 %539 }
 0x3ad   :  { %v544_v9 = vsub.f32 %v499_v6, %v540_v14 }
 0x3af   :  { %v546_v10 = vmul.f32 1.442695, %v544_v9 }
 0x3b1   :  { %1292 = vpow2.f32 %v546_v10 }
 0x3b2   :  { %1294 = vrcp.f32 %v371_v21 }
 0x3b5   :  { %v435_v35 = vpop.permute.xlu0 %434 }
 0x3b6   :  { %v1619_v11 = vpop.f32.mrf.mxu2 }
 0x3b7   :  { %v1621_v13 = vpop.eup %1292 }
 0x3b8   :  { %v550_v15 = vsel %vm353_vm6, %v1621_v13, 0.0  ;;  %v1295_v24 = vpop.eup %1294 }
 0x3b9   :  { %551 = vadd.xlane.f32.xlu2 %v550_v15  ;;  %v387_v29 = vmul.f32 %v1295_v24, %v371_v21  ;;  %vm392_vm11 = vweird.f32 %v1295_v24 }
 0x3ba   :  { %vm393_vm13 = vmor %vm391_vm12, %vm392_vm11 }
 0x3bb   :  { %v388_v31 = vsub.f32 1.0, %v387_v29 }
 0x3bd   :  { %v389_v33 = vmul.f32 %v1295_v24, %v388_v31  ;;  %v587_v47 = vpop.permute.xlu0 %586 }
 0x3be   :  { %v535_v16 = vpop.f32.mrf.mxu2 }
 0x3bf   :  { %v541_v56 = vsel %vm353_vm6, %v535_v16, -inf  ;;  %v390_v37 = vadd.f32 %v1295_v24, %v389_v33 }
 0x3c0   :  { %542 = vmax.xlane.f32.xlu1 %v541_v56 }
 0x3c1   :  { %v394_v42 = vsel %vm393_vm13, %v1295_v24, %v390_v37 }
 0x3c2   :  { %v399_v46 = vsel %vm396_vm14, %v398_v43, %v394_v42 }
 0x3c3   :  { %v401_v26 = vmul.f32 %v1602_v62, %v399_v46 }
 0x3c5   :  { %v619_v51 = vpop.permute.xlu0 %618 }
 0x3cd   :  { %v747_v29 = vpop.permute.xlu0 %746 }
 0x3d5   :  { %v713_v33 = vpop.permute.xlu0 %712 }
 0x3d9   :  { %1233 = vrot.lane.b32.xlu1 %v1232_v19, %s1346_s1 }
 0x3e1   :  { %1243 = vrot.lane.b32.xlu1 %v1232_v19, %s1347_s2 }
 0x3e9   :  { %750 = vrot.lane.b32.xlu1 %v1573_v25, %s1348_s4 }
 0x3f1   :  { %744 = vrot.lane.b32.xlu1 %v1579_v38, %s1348_s4 }
 0x3f9   :  { %710 = vrot.lane.b32.xlu1 %v1522_v5, %s1348_s4 }
 0x42c   :  { %v552_v52 = vpop.xlane.xlu2 %551 }
 0x42d   :  { %v567_v61 = vand.u32 2147483648, %v552_v52  ;;  %vm561_vm1 = vweird.f32 %v552_v52  ;;  %v565_v62 = vand.u32 2147483647, %v552_v52 }
 0x42f   :  { %v568_v3 = vor.u32 1.1754944e-38, %v567_v61  ;;  %vm566_vm3 = vcmp.eq.f32.partialorder %v565_v62, 8.507059e+37 }
 0x433   :  { %v543_v22 = vpop.xlane.xlu1 %542 }
 0x434   :  { %v545_v23 = vsub.f32 %v535_v16, %v543_v22 }
 0x436   :  { %v548_v18 = vmul.f32 1.442695, %v545_v23 }
 0x438   :  { %1296 = vpow2.f32 %v548_v18  ;;  %v282_v18 = vld [vmem:[%s1761_s5 + $0x10] sm:$0xff] }
 0x439   :  { %1298 = vrcp.f32 %v552_v52 }
 0x43e   :  { %v1636_v30 = vpop.eup %1296 }
 0x43f   :  { %v553_v32 = vsel %vm353_vm6, %v1636_v30, 0.0  ;;  %v1299_v53 = vpop.eup %1298 }
 0x440   :  { %554 = vadd.xlane.f32.xlu2 %v553_v32  ;;  %v557_v54 = vmul.f32 %v1299_v53, %v552_v52  ;;  %vm562_vm15 = vweird.f32 %v1299_v53 }
 0x441   :  { %vm563_vm2 = vmor %vm561_vm1, %vm562_vm15 }
 0x442   :  { %v558_v58 = vsub.f32 1.0, %v557_v54 }
 0x444   :  { %v559_v59 = vmul.f32 %v1299_v53, %v558_v58 }
 0x446   :  { %v560_v36 = vadd.f32 %v1299_v53, %v559_v59  ;;  %v285_v59 = vld [vmem:[%s1761_s5 + $0x28] sm:$0xff] }
 0x447   :  { %912 = vmatpush.msrb.mxu1 %v285_v59 }
 0x448   :  { %v564_v0 = vsel %vm563_vm2, %v1299_v53, %v560_v36 }
 0x449   :  { %v569_v7 = vsel %vm566_vm3, %v568_v3, %v564_v0 }
 0x44a   :  { %v584_v56 = vmul.f32 %v1621_v13, %v569_v7 }
 0x44b   :  { %v1234_v41 = vpop.permute.xlu1 %1233 }
 0x44c   :  { %v1235_v44 = vunpack.i.l.bf16 %v1234_v41  ;;  %v1236_v45 = vunpack.i.h.bf16 %v1234_v41 }
 0x44e   :  { %459 = vmatpush.msrb.mxu3 %v1235_v44 }
 0x450   :  { %460 = vmatpush.msrb.mxu3 %v1236_v45 }
 0x452   :  { %461 = vmatpush.msrb.mxu3 %v435_v35 }
 0x453   :  { %v1244_v48 = vpop.permute.xlu1 %1243  ;;  %1175 = vmatmul.msk.f32.vlgmr.msrb.gmra.mxu3 %vm353_vm6, %v401_v26 }
 0x454   :  { %v1245_v49 = vunpack.i.l.bf16 %v1244_v48  ;;  %v1246_v50 = vunpack.i.h.bf16 %v1244_v48 }
 0x456   :  { %643 = vmatpush.msra.mxu0 %v1245_v49 }
 0x458   :  { %1238 = vrot.lane.b32.xlu2 %v1543_v17, %s1347_s2  ;;  %644 = vmatpush.msra.mxu0 %v1246_v50 }
 0x45a   :  { %645 = vmatpush.msra.mxu0 %v619_v51 }
 0x45b   :  { %v751_v9 = vpop.permute.xlu1 %750 }
 0x45c   :  { %699 = vmatpush.msrb.mxu0 %v281_v55 }
 0x45e   :  { %700 = vmatpush.msrb.mxu0 %v280_v57 }
 0x460   :  { %748 = vrot.lane.b32.xlu2 %v1571_v34, %s1348_s4 }
 0x463   :  { %v745_v31 = vpop.permute.xlu1 %744 }
 0x468   :  { %714 = vrot.lane.b32.xlu2 %v1534_v20, %s1348_s4 }
 0x470   :  { %708 = vrot.lane.b32.xlu2 %v1554_v27, %s1348_s4 }
 0x478   :  { %1248 = vrot.lane.b32.xlu2 %v1232_v19, %s1349_s22  ;;  %v283_v19 = vld [vmem:[%s1761_s5 + $0x18] sm:$0xff] }
 0x480   :  { %860 = vrot.lane.b32.xlu2 %v1566_v28, %s1349_s22 }
 0x4b3   :  { %v555_v60 = vpop.xlane.xlu2 %554 }
 0x4b4   :  { %1300 = vrcp.f32 %v555_v60  ;;  %v581_v8 = vand.u32 2147483648, %v555_v60  ;;  %v579_v15 = vand.u32 2147483647, %v555_v60  ;;  %vm575_vm7 = vweird.f32 %v555_v60 }
 0x4b6   :  { %v582_v21 = vor.u32 1.1754944e-38, %v581_v8  ;;  %vm580_vm9 = vcmp.eq.f32.partialorder %v579_v15, 8.507059e+37 }
 0x4ba   :  { %v1301_v63 = vpop.eup %1300 }
 0x4bb   :  { %v571_v1 = vmul.f32 %v1301_v63, %v555_v60  ;;  %v1239_v2 = vpop.permute.xlu2 %1238  ;;  %vm576_vm4 = vweird.f32 %v1301_v63  ;;  %v284_v60 = vld [vmem:[%s1761_s5 + $0x20] sm:$0xff] }
 0x4bc   :  { %v1240_v4 = vunpack.i.l.bf16 %v1239_v2  ;;  %v1241_v14 = vunpack.i.h.bf16 %v1239_v2  ;;  %vm577_vm8 = vmor %vm575_vm7, %vm576_vm4  ;;  %913 = vmatpush.msrb.mxu1 %v284_v60 }
 0x4bd   :  { %v572_v6 = vsub.f32 1.0, %v571_v1 }
 0x4be   :  { %611 = vmatpush.msra.mxu3 %v1240_v4 }
 0x4bf   :  { %v573_v10 = vmul.f32 %v1301_v63, %v572_v6 }
 0x4c0   :  { %612 = vmatpush.msra.mxu3 %v1241_v14 }
 0x4c1   :  { %v574_v16 = vadd.f32 %v1301_v63, %v573_v10 }
 0x4c2   :  { %613 = vmatpush.msra.mxu3 %v587_v47 }
 0x4c3   :  { %v578_v22 = vsel %vm577_vm8, %v1301_v63, %v574_v16  ;;  %v749_v23 = vpop.permute.xlu2 %748  ;;  %1184 = vmatmul.msk.f32.vlgmr.msra.gmra.mxu3 %vm353_vm6, %v584_v56 }
 0x4c4   :  { %v583_v24 = vsel %vm580_vm9, %v582_v21, %v578_v22  ;;  %670 = vmatpush.msrb.mxu3 %v283_v19 }
 0x4c5   :  { %v585_v13 = vmul.f32 %v1636_v30, %v583_v24  ;;  %v711_v30 = vpop.permute.xlu1 %710 }
 0x4c6   :  { %671 = vmatpush.msrb.mxu3 %v282_v18 }
 0x4c7   :  { %1185 = vmatmul.msk.f32.vlgmr.msra.gmra.mxu0 %vm353_vm6, %v585_v13 }
 0x4c8   :  { %1194 = vmatpush.xpose.msk.msra.mxu3 %vm288_vm5, %v751_v9 }
 0x4cb   :  { %v715_v32 = vpop.permute.xlu2 %714 }
 0x4cc   :  { %1195 = vmatpush.xpose.msk.msra.mxu3 %vm288_vm5, %v749_v23  ;;  %1190 = vmatpush.xpose.msk.msrb.mxu2 %vm288_vm5, %v715_v32 }
 0x4cf   :  { %1188 = vmatmul.msk.f32.vlgmr.msrb.gmra.mxu0 %vm288_vm5, %v1619_v11 }
 0x4d0   :  { %1196 = vmatpush.xpose.msk.msra.mxu3 %vm288_vm5, %v747_v29  ;;  %1191 = vmatpush.xpose.msk.msrb.mxu2 %vm288_vm5, %v713_v33 }
 0x4d3   :  { %v709_v35 = vpop.permute.xlu2 %708 }
 0x4d4   :  { %1192 = vmatpush.xpose.msk.msrb.mxu2 %vm288_vm5, %v711_v30 }
 0x4d6   :  { %v463_v37 = vpop.f32.mrf.mxu3 }
 0x4d7   :  { %1189 = vmatmul.msk.f32.gmra.mxu0 %vm288_vm5, %v463_v37  ;;  %1193 = vmatmul.msk.f32.vlgmr.msrb.gmra.mxu2 %vm288_vm5, %v709_v35 }
 0x4db   :  { %v1249_v39 = vpop.permute.xlu2 %1248 }
 0x4dc   :  { %v1250_v40 = vunpack.i.l.bf16 %v1249_v39  ;;  %v1251_v41 = vunpack.i.h.bf16 %v1249_v39 }
 0x4de   :  { %885 = vmatpush.msra.mxu0 %v1250_v40 }
 0x4e0   :  { %886 = vmatpush.msra.mxu0 %v1251_v41 }
 0x4e3   :  { %v861_v42 = vpop.permute.xlu2 %860 }
 0x4e4   :  { %887 = vmatpush.msra.mxu0 %v861_v42 }
 0x544   :  { %v647_v11 = vpop.f32.mrf.mxu0 }
 0x546   :  { %v615_v43 = vpop.f32.mrf.mxu3 }
 0x547   :  { %1186 = vmatmul.msk.f32.vlgmr.msrb.gmra.mxu3 %vm288_vm5, %v615_v43 }
 0x54c   :  { %v1717_v40 = vpop.f32.mrf.mxu0 }
 0x54f   :  { %1187 = vmatmul.msk.f32.gmra.mxu3 %vm288_vm5, %v647_v11 }
 0x554   :  { %v705_v41 = vpop.f32.mrf.mxu0 }
 0x557   :  { %1197 = vmatmul.msk.f32.vlgmr.msra.gmra.mxu3 %vm288_vm5, %v745_v31 }
 0x55a   :  { %v741_v44 = vpop.f32.mrf.mxu2 }
 0x55b   :  { %v780_v45 = vsel %vm353_vm6, %v741_v44, -inf }
 0x55c   :  { %781 = vmax.xlane.f32.xlu2 %v780_v45 }
 0x574   :  { %929 = vrot.lane.b32.xlu2 %v1534_v20, %s1350_s30 }
 0x57c   :  { %959 = vrot.lane.b32.xlu2 %v1579_v38, %s1350_s30 }
 0x5ca   :  { %v1685_v46 = vpop.f32.mrf.mxu3 }
 0x5cf   :  { %v782_v47 = vpop.xlane.xlu2 %781 }
 0x5d0   :  { %v786_v26 = vsub.f32 %v741_v44, %v782_v47 }
 0x5d2   :  { %v1687_v48 = vpop.f32.mrf.mxu3  ;;  %v788_v49 = vmul.f32 1.442695, %v786_v26 }
 0x5d3   :  { %v706_v45 = vadd.f32 %v705_v41, %v1687_v48 }
 0x5d4   :  { %1302 = vpow2.f32 %v788_v49 }
 0x5d7   :  { %v930_v32 = vpop.permute.xlu2 %929 }
 0x5da   :  { %v777_v50 = vpop.f32.mrf.mxu3  ;;  %v1303_v52 = vpop.eup %1302 }
 0x5db   :  { %v783_v51 = vsel %vm353_vm6, %v777_v50, -inf  ;;  %v792_v53 = vsel %vm353_vm6, %v1303_v52, 0.0 }
 0x5dc   :  { %784 = vmax.xlane.f32.xlu0 %v783_v51 }
 0x5df   :  { %v960_v39 = vpop.permute.xlu2 %959 }
 0x5e4   :  { %793 = vadd.xlane.f32.xlu0 %v792_v53 }
 0x5f8   :  { %828 = vrot.lane.b32.xlu0 %v1522_v5, %s1349_s22 }
 0x600   :  { %925 = vrot.lane.b32.xlu0 %v1522_v5, %s1350_s30 }
 0x608   :  { %923 = vrot.lane.b32.xlu0 %v1554_v27, %s1350_s30 }
 0x610   :  { %961 = vrot.lane.b32.xlu0 %v1566_v28, %s1350_s30 }
 0x64f   :  { %v785_v20 = vpop.xlane.xlu0 %784 }
 0x650   :  { %v787_v38 = vsub.f32 %v777_v50, %v785_v20 }
 0x652   :  { %v790_v54 = vmul.f32 1.442695, %v787_v38 }
 0x654   :  { %1304 = vpow2.f32 %v790_v54 }
 0x657   :  { %v794_v27 = vpop.xlane.xlu0 %793 }
 0x658   :  { %1306 = vrcp.f32 %v794_v27  ;;  %v809_v15 = vand.u32 2147483648, %v794_v27  ;;  %vm803_vm15 = vweird.f32 %v794_v27  ;;  %v807_v16 = vand.u32 2147483647, %v794_v27 }
 0x65a   :  { %v1305_v55 = vpop.eup %1304  ;;  %v810_v22 = vor.u32 1.1754944e-38, %v809_v15  ;;  %vm808_vm2 = vcmp.eq.f32.partialorder %v807_v16, 8.507059e+37 }
 0x65b   :  { %v795_v57 = vsel %vm353_vm6, %v1305_v55, 0.0 }
 0x65c   :  { %796 = vadd.xlane.f32.xlu1 %v795_v57 }
 0x65e   :  { %v1307_v36 = vpop.eup %1306 }
 0x65f   :  { %v799_v61 = vmul.f32 %v1307_v36, %v794_v27  ;;  %vm804_vm14 = vweird.f32 %v1307_v36 }
 0x660   :  { %vm805_vm1 = vmor %vm803_vm15, %vm804_vm14 }
 0x661   :  { %v800_v1 = vsub.f32 1.0, %v799_v61  ;;  %v287_v61 = vld [vmem:[%s1761_s5 + $0x38] sm:$0xff] }
 0x662   :  { %1127 = vmatpush.msra.mxu1 %v287_v61 }
 0x663   :  { %v801_v7 = vmul.f32 %v1307_v36, %v800_v1 }
 0x665   :  { %v802_v10 = vadd.f32 %v1307_v36, %v801_v7 }
 0x667   :  { %v806_v19 = vsel %vm805_vm1, %v1307_v36, %v802_v10  ;;  %v1262_v36 = vpack.i.bf16 %v1573_v25, %v1522_v5 }
 0x668   :  { %v811_v18 = vsel %vm808_vm2, %v810_v22, %v806_v19 }
 0x669   :  { %v826_v29 = vmul.f32 %v1303_v52, %v811_v18 }
 0x66a   :  { %v829_v56 = vpop.permute.xlu0 %828 }
 0x672   :  { %v926_v13 = vpop.permute.xlu0 %925 }
 0x675   :  { %1253 = vrot.lane.b32.xlu1 %v1543_v17, %s1349_s22 }
 0x67a   :  { %v924_v30 = vpop.permute.xlu0 %923 }
 0x67d   :  { %927 = vrot.lane.b32.xlu1 %v1529_v12, %s1350_s30 }
 0x682   :  { %v962_v37 = vpop.permute.xlu0 %961 }
 0x685   :  { %965 = vrot.lane.b32.xlu1 %v1573_v25, %s1350_s30 }
 0x68d   :  { %963 = vrot.lane.b32.xlu1 %v1571_v34, %s1350_s30 }
 0x6cf   :  { %v797_v58 = vpop.xlane.xlu1 %796 }
 0x6d0   :  { %1308 = vrcp.f32 %v797_v58  ;;  %v823_v0 = vand.u32 2147483648, %v797_v58  ;;  %v821_v3 = vand.u32 2147483647, %v797_v58  ;;  %vm817_vm11 = vweird.f32 %v797_v58 }
 0x6d2   :  { %v824_v6 = vor.u32 1.1754944e-38, %v823_v0  ;;  %vm822_vm13 = vcmp.eq.f32.partialorder %v821_v3, 8.507059e+37 }
 0x6d6   :  { %v1309_v12 = vpop.eup %1308 }
 0x6d7   :  { %v813_v62 = vmul.f32 %v1309_v12, %v797_v58  ;;  %vm818_vm10 = vweird.f32 %v1309_v12 }
 0x6d8   :  { %vm819_vm12 = vmor %vm817_vm11, %vm818_vm10 }
 0x6d9   :  { %v814_v63 = vsub.f32 1.0, %v813_v62 }
 0x6db   :  { %v815_v2 = vmul.f32 %v1309_v12, %v814_v63 }
 0x6dd   :  { %v816_v4 = vadd.f32 %v1309_v12, %v815_v2 }
 0x6df   :  { %v820_v8 = vsel %vm819_vm12, %v1309_v12, %v816_v4 }
 0x6e0   :  { %v825_v14 = vsel %vm822_vm13, %v824_v6, %v820_v8 }
 0x6e1   :  { %v827_v9 = vmul.f32 %v1305_v55, %v825_v14  ;;  %v1267_v55 = vpack.i.bf16 %v1566_v28, %v1571_v34 }
 0x6e3   :  { %1199 = vmatmul.msk.f32.vlgmr.msra.gmra.mxu0 %vm353_vm6, %v827_v9 }
 0x6e7   :  { %v1254_v21 = vpop.permute.xlu1 %1253 }
 0x6e8   :  { %v1255_v23 = vunpack.i.l.bf16 %v1254_v21  ;;  %v1256_v24 = vunpack.i.h.bf16 %v1254_v21 }
 0x6ea   :  { %853 = vmatpush.msra.mxu2 %v1255_v23 }
 0x6ec   :  { %854 = vmatpush.msra.mxu2 %v1256_v24 }
 0x6ee   :  { %855 = vmatpush.msra.mxu2 %v829_v56 }
 0x6ef   :  { %v928_v31 = vpop.permute.xlu1 %927  ;;  %1198 = vmatmul.msk.f32.vlgmr.msra.gmra.mxu2 %vm353_vm6, %v826_v29 }
 0x6f0   :  { %1214 = vmatpush.msrb.mxu2 %v285_v59 }
 0x6f2   :  { %1215 = vmatpush.msrb.mxu2 %v284_v60 }
 0x6f4   :  { %1202 = vmatpush.xpose.msk.msra.mxu2 %vm288_vm5, %v930_v32  ;;  %v286_v32 = vld [vmem:[%s1761_s5 + $0x30] sm:$0xff] }
 0x6f5   :  { %1128 = vmatpush.msra.mxu1 %v286_v32 }
 0x6f7   :  { %v966_v33 = vpop.permute.xlu1 %965 }
 0x6f8   :  { %1203 = vmatpush.xpose.msk.msra.mxu2 %vm288_vm5, %v928_v31  ;;  %1206 = vmatpush.xpose.msk.msrb.mxu3 %vm288_vm5, %v966_v33 }
 0x6fc   :  { %1204 = vmatpush.xpose.msk.msra.mxu2 %vm288_vm5, %v926_v13 }
 0x6ff   :  { %v964_v35 = vpop.permute.xlu1 %963 }
 0x700   :  { %1207 = vmatpush.xpose.msk.msrb.mxu3 %vm288_vm5, %v964_v35 }
 0x704   :  { %1208 = vmatpush.xpose.msk.msrb.mxu3 %vm288_vm5, %v962_v37  ;;  %v703_v37 = vadd.f32 %v1717_v40, %v1685_v46 }
 0x707   :  { %1209 = vmatmul.msk.f32.vlgmr.msrb.gmra.mxu3 %vm288_vm5, %v960_v39 }
 0x760   :  { %v889_v42 = vpop.f32.mrf.mxu0 }
 0x761   :  { %1201 = vmatmul.msk.f32.vlgmr.msrb.gmra.mxu2 %vm288_vm5, %v889_v42 }
 0x769   :  { %1205 = vmatmul.msk.f32.vlgmr.msra.gmra.mxu2 %vm288_vm5, %v924_v30 }
 0x772   :  { %v857_v43 = vpop.f32.mrf.mxu2 }
 0x773   :  { %1200 = vmatmul.msk.f32.vlgmr.msrb.gmra.mxu1 %vm288_vm5, %v857_v43 }
 0x78a   :  { %v992_v11 = vpop.f32.mrf.mxu3 }
 0x78b   :  { %v998_v44 = vsel %vm353_vm6, %v992_v11, -inf }
 0x78c   :  { %999 = vmax.xlane.f32.xlu0 %v998_v44 }
 0x7a0   :  { %1258 = vrot.lane.b32.xlu0 %v1543_v17, %s1351_s0 }
 0x7e4   :  { %v918_v47 = vpop.f32.mrf.mxu2 }
 0x7e5   :  { %v1725_v26 = vadd.f32 %v918_v47, %v706_v45 }
 0x7ec   :  { %v956_v49 = vpop.f32.mrf.mxu2 }
 0x7ed   :  { %v995_v50 = vsel %vm353_vm6, %v956_v49, -inf }
 0x7ee   :  { %996 = vmax.xlane.f32.xlu1 %v995_v50 }
 0x7f0   :  { %v915_v35 = vpop.f32.mrf.mxu1 }
 0x7f1   :  { %v921_v39 = vadd.f32 %v915_v35, %v703_v37 }
 0x7ff   :  { %v1000_v51 = vpop.xlane.xlu0 %999 }
 0x800   :  { %v1002_v52 = vsub.f32 %v992_v11, %v1000_v51 }
 0x802   :  { %v1005_v53 = vmul.f32 1.442695, %v1002_v52 }
 0x804   :  { %1310 = vpow2.f32 %v1005_v53 }
 0x80a   :  { %v1728_v20 = vpop.eup %1310 }
 0x80b   :  { %v1010_v38 = vsel %vm353_vm6, %v1728_v20, 0.0 }
 0x80c   :  { %1011 = vadd.xlane.f32.xlu1 %v1010_v38 }
 0x812   :  { %v1259_v17 = vpop.permute.xlu0 %1258 }
 0x813   :  { %v1260_v54 = vunpack.i.l.bf16 %v1259_v17  ;;  %v1261_v48 = vunpack.i.h.bf16 %v1259_v17 }
 0x815   :  { %1068 = vmatpush.msrb.mxu0 %v1260_v54 }
 0x817   :  { %1069 = vmatpush.msrb.mxu0 %v1261_v48 }
 0x825   :  { %1268 = vrot.lane.b32.xlu1 %v1267_v55, %s1351_s0 }
 0x861   :  { %v997_v57 = vpop.xlane.xlu1 %996 }
 0x862   :  { %v1001_v27 = vsub.f32 %v956_v49, %v997_v57 }
 0x864   :  { %v1003_v58 = vmul.f32 1.442695, %v1001_v27 }
 0x866   :  { %1312 = vpow2.f32 %v1003_v58 }
 0x86c   :  { %v1313_v59 = vpop.eup %1312 }
 0x86d   :  { %v1007_v60 = vsel %vm353_vm6, %v1313_v59, 0.0 }
 0x86e   :  { %1008 = vadd.xlane.f32.xlu2 %v1007_v60 }
 0x87f   :  { %v1012_v12 = vpop.xlane.xlu1 %1011 }
 0x880   :  { %1314 = vrcp.f32 %v1012_v12  ;;  %v1038_v21 = vand.u32 2147483648, %v1012_v12  ;;  %vm1032_vm10 = vweird.f32 %v1012_v12  ;;  %v1036_v23 = vand.u32 2147483647, %v1012_v12 }
 0x882   :  { %v1039_v29 = vor.u32 1.1754944e-38, %v1038_v21  ;;  %vm1037_vm12 = vcmp.eq.f32.partialorder %v1036_v23, 8.507059e+37 }
 0x886   :  { %1263 = vrot.lane.b32.xlu2 %v1262_v36, %s1351_s0  ;;  %v1315_v28 = vpop.eup %1314 }
 0x887   :  { %v1028_v62 = vmul.f32 %v1315_v28, %v1012_v12  ;;  %vm1033_vm8 = vweird.f32 %v1315_v28 }
 0x888   :  { %vm1034_vm11 = vmor %vm1032_vm10, %vm1033_vm8 }
 0x889   :  { %v1029_v0 = vsub.f32 1.0, %v1028_v62 }
 0x88b   :  { %v1030_v25 = vmul.f32 %v1315_v28, %v1029_v0 }
 0x88d   :  { %v1031_v56 = vadd.f32 %v1315_v28, %v1030_v25 }
 0x88f   :  { %v1035_v24 = vsel %vm1034_vm11, %v1315_v28, %v1031_v56 }
 0x890   :  { %v1040_v13 = vsel %vm1037_vm12, %v1039_v29, %v1035_v24 }
 0x891   :  { %v1042_v31 = vmul.f32 %v1728_v20, %v1040_v13 }
 0x897   :  { %v1269_v3 = vpop.permute.xlu1 %1268 }
 0x898   :  { %v1270_v8 = vunpack.i.l.bf16 %v1269_v3  ;;  %v1271_v10 = vunpack.i.h.bf16 %v1269_v3 }
 0x8e1   :  { %v1009_v34 = vpop.xlane.xlu2 %1008 }
 0x8e2   :  { %1316 = vrcp.f32 %v1009_v34  ;;  %v1024_v7 = vand.u32 2147483648, %v1009_v34  ;;  %v1022_v9 = vand.u32 2147483647, %v1009_v34  ;;  %vm1018_vm4 = vweird.f32 %v1009_v34 }
 0x8e4   :  { %v1025_v16 = vor.u32 1.1754944e-38, %v1024_v7  ;;  %vm1023_vm9 = vcmp.eq.f32.partialorder %v1022_v9, 8.507059e+37 }
 0x8e8   :  { %v1317_v63 = vpop.eup %1316 }
 0x8e9   :  { %v1014_v1 = vmul.f32 %v1317_v63, %v1009_v34  ;;  %v1264_v2 = vpop.permute.xlu2 %1263  ;;  %vm1019_vm3 = vweird.f32 %v1317_v63 }
 0x8ea   :  { %v1266_v4 = vunpack.i.h.bf16 %v1264_v2  ;;  %v1265_v6 = vunpack.i.l.bf16 %v1264_v2  ;;  %vm1020_vm7 = vmor %vm1018_vm4, %vm1019_vm3 }
 0x8eb   :  { %v1015_v5 = vsub.f32 1.0, %v1014_v1 }
 0x8ec   :  { %1070 = vmatpush.msrb.mxu0 %v1265_v6 }
 0x8ed   :  { %v1016_v14 = vmul.f32 %v1317_v63, %v1015_v5 }
 0x8ee   :  { %1100 = vmatpush.msra.mxu0 %v1266_v4 }
 0x8ef   :  { %v1017_v15 = vadd.f32 %v1317_v63, %v1016_v14 }
 0x8f0   :  { %1101 = vmatpush.msra.mxu0 %v1270_v8 }
 0x8f1   :  { %v1021_v19 = vsel %vm1020_vm7, %v1317_v63, %v1017_v15 }
 0x8f2   :  { %1102 = vmatpush.msra.mxu0 %v1271_v10  ;;  %v1026_v22 = vsel %vm1023_vm9, %v1025_v16, %v1021_v19 }
 0x8f3   :  { %v1041_v18 = vmul.f32 %v1313_v59, %v1026_v22 }
 0x8f5   :  { %1210 = vmatmul.msk.f32.vlgmr.msrb.gmra.mxu0 %vm353_vm6, %v1041_v18 }
 0x8fd   :  { %1211 = vmatmul.msk.f32.vlgmr.msra.gmra.mxu0 %vm353_vm6, %v1042_v31 }
 0x972   :  { %v1072_v33 = vpop.f32.mrf.mxu0 }
 0x973   :  { %1212 = vmatmul.msk.f32.vlgmr.msra.gmra.mxu1 %vm288_vm5, %v1072_v33 }
 0x97a   :  { %v1104_v30 = vpop.f32.mrf.mxu0 }
 0x97b   :  { %1213 = vmatmul.msk.f32.gmra.mxu1 %vm288_vm5, %v1104_v30 }
 0x9f0   :  { %v1130_v41 = vpop.f32.mrf.mxu1 }
 0x9f1   :  { %v1136_v42 = vadd.f32 %v1130_v41, %v921_v39 }
 0x9f3   :  { %1138 = vst.msk [vmem:[#allocation2] sm:$0xff] %vm30_vm0, %v1136_v42 }
 0x9f8   :  { %v1133_v43 = vpop.f32.mrf.mxu1 }
 0x9f9   :  { %v1137_v11 = vadd.f32 %v1133_v43, %v1725_v26 }
 0x9fb   :  { %1139 = vst.msk [vmem:[#allocation2 + $0x8] sm:$0xff] %vm30_vm0, %v1137_v11 }
 0x9fc   :  { %1152 = dma.vmem_to_hbm [thread:$0]  %s1145_s16, 256, %s1147_s18, [#allocation3], %s1353_s19, %s1353_s19, %s1354_s20  }
 0x9fd   :  { %1342 = dma.done.wait [#allocation3], 256  }
 0x9fe   :  { %1343 = vsyncadd [#allocation3], 4294967040 }
 0x9ff   :  { %1157 = vsyncpa [#allocation3], 1 }

</bundles_post_ra>
